<compile_context>
chip_gen: v7x
topology: tpu7x:2x2x1
jax: 0.10.0
libtpu: 0.0.40
codegen_flags: <defaults>
</compile_context>

<pallas_src>
import functools

import jax
import jax.numpy as jnp
from jax.experimental import pallas as pl
from jax.experimental.pallas import tpu as pltpu


def _cumprod_kernel(x_ref, o_ref, carry_ref, *, single_chunk):
    """Inclusive cumprod along the last (lane) axis of each (TB, TN) block,
    carrying a per-row running product across seq chunks (grid axis 1)."""
    tb, tn = x_ref.shape
    acc_dtype = carry_ref.dtype
    k = pl.program_id(1)

    if not single_chunk:
        # New batch tile -> reset the running product.
        @pl.when(k == 0)
        def _init():
            carry_ref[...] = jnp.ones(carry_ref.shape, carry_ref.dtype)

    if tn % 128 == 0:
        # Two-level scan over 128-lane segments.
        num_seg = tn // 128
        # (1, 128) lane-index iota + 0-d identity: no full-tile temporaries.
        col = jax.lax.broadcasted_iota(jnp.int32, (1, 128), 1)
        one = jnp.ones((), acc_dtype)
        # Running prefix (product of everything strictly before this segment).
        prefix = None if single_chunk else carry_ref[...]  # (tb, 1)

        for j in range(num_seg):
            lo = j * 128
            seg = x_ref[:, lo:lo + 128].astype(acc_dtype)
            # Intra-segment Hillis-Steele scan: 7 pure lane rotations (XLU)
            # + select/mul (VALU), confined to one vreg width.
            shift = 1
            while shift < 128:
                rolled = pltpu.roll(seg, shift=shift, axis=1)
                seg = seg * jnp.where(col >= shift, rolled, one)
                shift *= 2
            if prefix is not None:
                seg = seg * prefix            # broadcast (tb, 1) over lanes
            o_ref[:, lo:lo + 128] = seg.astype(o_ref.dtype)
            prefix = seg[:, 127:128]          # inclusive prefix so far

        if not single_chunk:
            carry_ref[...] = prefix
    else:
        # Tiny / unaligned seq axis (block spans the whole seq): concatenate
        # formulation — only hit for toy shapes (N < 128) where the kernel is
        # pure fixed overhead anyway.
        acc = x_ref[...].astype(acc_dtype)
        shift = 1
        while shift < tn:
            pad = jnp.ones((tb, shift), dtype=acc_dtype)
            acc = acc * jnp.concatenate([pad, acc[:, : tn - shift]], axis=1)
            shift *= 2
        if not single_chunk:
            acc = acc * carry_ref[...]
            carry_ref[...] = acc[:, tn - 1: tn]
        o_ref[...] = acc.astype(o_ref.dtype)


def _vmem_budget():
    """(max_block_bytes, vmem_limit_bytes) tuned per chip generation."""
    cap = None
    try:
        info = pltpu.get_tpu_info()
        cap = getattr(info, "vmem_capacity_bytes", None)
    except Exception:
        cap = None
    if cap is not None and cap >= 96 * 1024 * 1024:
        # v5e / v6e: 128 MiB physical VMEM -> bigger blocks, bigger limit.
        return 4 * 1024 * 1024, 64 * 1024 * 1024
    # v7x (64 MiB VMEM) or unknown: stay conservative.
    return 2 * 1024 * 1024, 32 * 1024 * 1024


def _choose_tiles(B, N, *, max_block_bytes, itemsize=4):
    """Pick (TB, TN): TB multiple of 8 (or == B), TN multiple of 128 (or == N)."""
    # Seq chunks: two-level scan cost is independent of TN, so use long
    # lane-aligned chunks (8 KiB contiguous DMA rows) with a carried product.
    if N < 128:
        TN = N                               # whole seq, fallback path
    elif N % 128 == 0:
        TN = min(N, 2048)
    else:
        TN = min((N // 128) * 128, 2048)     # partial last seq chunk

    if B <= 8:
        return B, TN

    rows = max(8, ((max_block_bytes // (TN * itemsize)) // 8) * 8)
    TB = min((B // 8) * 8, rows, 1024)
    # v7x megacore: guarantee >= 2 batch tiles so the "parallel" axis can be
    # sharded across both TensorCores (no effect on single-TC chips).
    if B >= 16:
        half = max(8, (pl.cdiv(B, 2) // 8) * 8)
        TB = min(TB, half)
    return max(TB, 8), TN


def cumprod_dim1(x: jax.Array, *, tb=None, tn=None) -> jax.Array:
    """cumprod along dim=1 of a 2-D (batch, seq) array, via Pallas on TPU."""
    assert x.ndim == 2, "this kernel handles (batch, seq) inputs (dim=1 scan)"
    B, N = x.shape
    if B == 0 or N == 0:
        return x

    # Accumulate floats in f32 (exact for f32 inputs, more accurate for bf16);
    # keep integer dtypes in their native integer type.
    acc_dtype = jnp.float32 if jnp.issubdtype(x.dtype, jnp.floating) else x.dtype

    max_block_bytes, vmem_limit = _vmem_budget()
    auto_tb, auto_tn = _choose_tiles(B, N, max_block_bytes=max_block_bytes)
    TB = tb if tb is not None else auto_tb
    TN = tn if tn is not None else auto_tn
    # BlockSpec legality: last two block dims divide (8, 128) or equal array dims.
    assert TB == B or TB % 8 == 0, "batch tile must be a multiple of 8 or == B"
    assert TN == N or TN % 128 == 0, "seq tile must be a multiple of 128 or == N"

    grid = (pl.cdiv(B, TB), pl.cdiv(N, TN))
    single_chunk = grid[1] == 1
    kernel = functools.partial(_cumprod_kernel, single_chunk=single_chunk)

    return pl.pallas_call(
        kernel,
        out_shape=jax.ShapeDtypeStruct((B, N), x.dtype),
        grid_spec=pltpu.PrefetchScalarGridSpec(
            num_scalar_prefetch=0,
            grid=grid,
            in_specs=[pl.BlockSpec((TB, TN), lambda i, k: (i, k))],
            out_specs=pl.BlockSpec((TB, TN), lambda i, k: (i, k)),
            scratch_shapes=[pltpu.VMEM((TB, 1), acc_dtype)],
        ),
        compiler_params=pltpu.CompilerParams(
            # batch tiles independent -> parallel (megacore); seq chunks carry
            # the running product -> arbitrary, last in the grid.
            dimension_semantics=("parallel", "arbitrary"),
            vmem_limit_bytes=vmem_limit,
        ),
    )(x)


if __name__ == "__main__":
    # Small (batch_size, seq_len) consistent with the module; cumprod along dim=1.
    key = jax.random.PRNGKey(0)
    B, N = 8, 32
    x = jax.random.normal(key, (B, N), dtype=jnp.float32)
    out = jax.block_until_ready(cumprod_dim1(x))
    ref = jnp.cumprod(x, axis=1)
    assert out.shape == ref.shape and out.dtype == ref.dtype
    assert jnp.allclose(out, ref, rtol=1e-4, atol=1e-6), "mismatch (small shape)"

    # Regression guard for pltpu.roll direction: lane-aligned 128-wide chunks,
    # multi-chunk carry, multiple batch tiles.
    x2 = jax.random.normal(jax.random.PRNGKey(1), (24, 256), dtype=jnp.float32)
    out2 = jax.block_until_ready(cumprod_dim1(x2, tb=8, tn=128))
    ref2 = jnp.cumprod(x2, axis=1)
    assert jnp.allclose(out2, ref2, rtol=1e-3, atol=1e-6), "mismatch (tiled shape)"

    # Ragged batch/seq -> partial blocks on both grid axes + multi-segment scan.
    x3 = jax.random.normal(jax.random.PRNGKey(2), (10, 300), dtype=jnp.float32)
    out3 = jax.block_until_ready(cumprod_dim1(x3, tb=8, tn=256))
    ref3 = jnp.cumprod(x3, axis=1)
    assert jnp.allclose(out3, ref3, rtol=1e-3, atol=1e-6), "mismatch (ragged shape)"

    # Auto tile selection path (N not a multiple of 128, B not a multiple of 8).
    x4 = jax.random.uniform(jax.random.PRNGKey(3), (20, 500), dtype=jnp.float32,
                            minval=0.5, maxval=1.5)
    out4 = jax.block_until_ready(cumprod_dim1(x4))
    ref4 = jnp.cumprod(x4, axis=1)
    assert jnp.allclose(out4, ref4, rtol=1e-3, atol=1e-10), "mismatch (auto tiles)"

    print("KERNEL_OK")
</pallas_src>

<mosaic_0001>
module attributes {stable_mosaic.version = 11 : i64} {
  func.func @_cumprod_kernel(%arg0: i32, %arg1: i32, %arg2: memref<8x32xf32, #tpu.memory_space<vmem>>, %arg3: memref<8x32xf32, #tpu.memory_space<vmem>>, %arg4: memref<8x1xf32, #tpu.memory_space<vmem>>) attributes {dimension_semantics = [#tpu.dimension_semantics<parallel>, #tpu.dimension_semantics<arbitrary>], iteration_bounds = array<i64: 1, 1>, scalar_prefetch = 0 : i64, scratch_operands = 1 : i64, tpu.core_type = #tpu.core_type<tc>, window_params = [{transform_indices = @transform_0, window_bounds = array<i64: 8, 32>}, {transform_indices = @transform_1, window_bounds = array<i64: 8, 32>}]} {
    %c0 = arith.constant 0 : index
    %c0_0 = arith.constant 0 : index
    %0 = vector.load %arg2[%c0, %c0_0] : memref<8x32xf32, #tpu.memory_space<vmem>>, vector<8x32xf32>
    %cst = arith.constant 1.000000e+00 : f32
    %1 = vector.broadcast %cst : f32 to vector<8x1xf32>
    %2 = vector.extract_strided_slice %0 {offsets = [0, 0], sizes = [8, 31], strides = [1, 1]} : vector<8x32xf32> to vector<8x31xf32>
    %3 = tpu.concatenate %1, %2 in 1 : vector<8x1xf32>, vector<8x31xf32> -> vector<8x32xf32>
    %4 = arith.mulf %0, %3 : vector<8x32xf32>
    %cst_1 = arith.constant 1.000000e+00 : f32
    %5 = vector.broadcast %cst_1 : f32 to vector<8x2xf32>
    %6 = vector.extract_strided_slice %4 {offsets = [0, 0], sizes = [8, 30], strides = [1, 1]} : vector<8x32xf32> to vector<8x30xf32>
    %7 = tpu.concatenate %5, %6 in 1 : vector<8x2xf32>, vector<8x30xf32> -> vector<8x32xf32>
    %8 = arith.mulf %4, %7 : vector<8x32xf32>
    %cst_2 = arith.constant 1.000000e+00 : f32
    %9 = vector.broadcast %cst_2 : f32 to vector<8x4xf32>
    %10 = vector.extract_strided_slice %8 {offsets = [0, 0], sizes = [8, 28], strides = [1, 1]} : vector<8x32xf32> to vector<8x28xf32>
    %11 = tpu.concatenate %9, %10 in 1 : vector<8x4xf32>, vector<8x28xf32> -> vector<8x32xf32>
    %12 = arith.mulf %8, %11 : vector<8x32xf32>
    %cst_3 = arith.constant 1.000000e+00 : f32
    %13 = vector.broadcast %cst_3 : f32 to vector<8x8xf32>
    %14 = vector.extract_strided_slice %12 {offsets = [0, 0], sizes = [8, 24], strides = [1, 1]} : vector<8x32xf32> to vector<8x24xf32>
    %15 = tpu.concatenate %13, %14 in 1 : vector<8x8xf32>, vector<8x24xf32> -> vector<8x32xf32>
    %16 = arith.mulf %12, %15 : vector<8x32xf32>
    %cst_4 = arith.constant 1.000000e+00 : f32
    %17 = vector.broadcast %cst_4 : f32 to vector<8x16xf32>
    %18 = vector.extract_strided_slice %16 {offsets = [0, 0], sizes = [8, 16], strides = [1, 1]} : vector<8x32xf32> to vector<8x16xf32>
    %19 = tpu.concatenate %17, %18 in 1 : vector<8x16xf32>, vector<8x16xf32> -> vector<8x32xf32>
    %20 = arith.mulf %16, %19 : vector<8x32xf32>
    %c0_5 = arith.constant 0 : index
    %c0_6 = arith.constant 0 : index
    %21 = vector.load %arg3[%c0_5, %c0_6] : memref<8x32xf32, #tpu.memory_space<vmem>>, vector<8x32xf32>
    tpu.vector_store %arg3[%c0_5, %c0_6], %20 {strides = array<i32>} : memref<8x32xf32, #tpu.memory_space<vmem>>, vector<8x32xf32>,
    return
  }
  func.func @transform_0(%arg0: i32, %arg1: i32) -> (i32, i32) {
    %c0_i32 = arith.constant 0 : i32
    return %arg0, %arg1 : i32, i32
  }
  func.func @transform_1(%arg0: i32, %arg1: i32) -> (i32, i32) {
    %c0_i32 = arith.constant 0 : i32
    return %arg0, %arg1 : i32, i32
  }
}

</mosaic_0001>

<bundles_post_ra>
// kernel: tpu_custom_call.1
= control target key start
LH: loop header
LB: loop body
LE: loop exit
PB: predicated region body
PF: predicated region fallthrough
CT: control target
= control target key end

     0   :  { %6 = vsyncpa [#allocation4], 0  ;;  %s170_s0 = inlined_call_operand.hbm [shape: f32[8,32], index: 0, kind: input, shape index: {}]   ;;  %s171_s1 = inlined_call_operand.hbm [shape: f32[8,32], index: 1, kind: output, shape index: {}]  }
   0x1   :  { %7 = vsyncpa [#allocation5], 0  ;;  %s129_s6 = smov [#allocation3]   ;;  %s81_s10 = scalar_lea.hbm %s170_s0, 128 }
   0x2   :  { %s14_s7 = sshll.u32 %s129_s6, 4  ;;  %p82_p0 = scmp.ne.s32.totalorder %s170_s0, %s81_s10  ;;  %s15_s7 = int_to_ptr.vmem [resolvable:$true] %s14_s7 }
   0x3   :  { %p85_p1 = scmp.lt.u32.totalorder %s81_s10, %s170_s0 }
   0x5   :  { %p87_p2 = pnand %p85_p1, %p82_p0 }
   0x7   :  { %90 = shalt.err (!%p87_p2)
}
   0x8   :  { %s91_s15 = scalar_lea.vmem %s15_s7, 128  ;;  %p96_p4 = scmp.lt.s32.totalorder %s15_s7, %s15_s7 }
   0x9   :  { %p92_p3 = scmp.ne.s32.totalorder %s15_s7, %s91_s15  ;;  %p97_p5 = scmp.lt.s32.totalorder %s91_s15, %s91_s15 }
   0xb   :  { %p98_p6 = por %p97_p5, %p96_p4 }
   0xd   :  { %p99_p7 = pnand %p98_p6, %p92_p3 }
   0xf   :  { %102 = shalt.err (!%p99_p7)
}
  0x10   :  { %17 = dma.hbm_to_vmem [thread:$0]  %s170_s0, 128, %s15_s7, [#allocation4]  }
  0x11   :  { %125 = dma.done.wait [#allocation4], 128  }
  0x12   :  { %126 = vsyncadd [#allocation4], 4294967168  ;;  %v21_v0 = vld [vmem:[#allocation3] sm:$0xff]  ;;  %s130_s18 = smov 1   ;;  %vm26_vm0 = vcmask 7168   ;;  %s131_s19 = smov 2  }
  0x13   :  { %23 = vrot.lane.b32.xlu0 %v21_v0, %s130_s18  ;;  %vm33_vm1 = vcmask 15360   ;;  %s132_s20 = smov 4   ;;  %vm40_vm2 = vcmask 31744   ;;  %s133_s0 = smov 8   ;;  %vm47_vm3 = vcmask 64512   ;;  %vm54_vm4 = vcmask 130048  }
  0x14   :  { %s134_s21 = smov 16   ;;  %s135_s22 = smov [#allocation6]   ;;  %vm57_vm5 = vcmask 261120  }
  0x15   :  { %s65_s23 = sshll.u32 %s135_s22, 4  ;;  %s66_s23 = int_to_ptr.vmem [resolvable:$true] %s65_s23 }
  0x16   :  { %s103_s24 = scalar_lea.vmem %s66_s23, 128  ;;  %p108_p9 = scmp.lt.s32.totalorder %s66_s23, %s66_s23 }
  0x17   :  { %p104_p8 = scmp.ne.s32.totalorder %s66_s23, %s103_s24  ;;  %p109_p10 = scmp.lt.s32.totalorder %s103_s24, %s103_s24 }
  0x19   :  { %p110_p11 = por %p109_p10, %p108_p9 }
  0x1b   :  { %p111_p12 = pnand %p110_p11, %p104_p8 }
  0x85   :  { %v24_v1 = vpop.permute.xlu0 %23 }
  0x86   :  { %v27_v2 = vsel %vm26_vm0, 1.0, %v24_v1 }
  0x87   :  { %v28_v3 = vmul.f32 %v27_v2, %v21_v0 }
  0x89   :  { %30 = vrot.lane.b32.xlu0 %v28_v3, %s131_s19 }
  0xfb   :  { %v31_v4 = vpop.permute.xlu0 %30 }
  0xfc   :  { %v34_v5 = vsel %vm33_vm1, 1.0, %v31_v4 }
  0xfd   :  { %v35_v6 = vmul.f32 %v34_v5, %v28_v3 }
  0xff   :  { %37 = vrot.lane.b32.xlu1 %v35_v6, %s132_s20 }
 0x171   :  { %v38_v7 = vpop.permute.xlu1 %37 }
 0x172   :  { %v41_v8 = vsel %vm40_vm2, 1.0, %v38_v7 }
 0x173   :  { %v42_v9 = vmul.f32 %v41_v8, %v35_v6 }
 0x175   :  { %44 = vrot.lane.b32.xlu1 %v42_v9, %s133_s0 }
 0x1e7   :  { %v45_v10 = vpop.permute.xlu1 %44 }
 0x1e8   :  { %v48_v11 = vsel %vm47_vm3, 1.0, %v45_v10 }
 0x1e9   :  { %v49_v12 = vmul.f32 %v48_v11, %v42_v9 }
 0x1eb   :  { %51 = vrot.lane.b32.xlu0 %v49_v12, %s134_s21 }
 0x25d   :  { %v52_v13 = vpop.permute.xlu0 %51 }
 0x25e   :  { %v55_v14 = vsel %vm54_vm4, 1.0, %v52_v13 }
 0x25f   :  { %v56_v15 = vmul.f32 %v55_v14, %v49_v12 }
 0x261   :  { %58 = vst.msk [vmem:[#allocation6] sm:$0xff] %vm57_vm5, %v56_v15 }
 0x262   :  { %114 = shalt.err (!%p111_p12)
}
 0x263   :  { %s115_s27 = scalar_lea.hbm %s171_s1, 128 }
 0x264   :  { %p116_p13 = scmp.ne.s32.totalorder %s171_s1, %s115_s27  ;;  %p119_p0 = scmp.lt.u32.totalorder %s115_s27, %s171_s1 }
 0x266   :  { %p121_p1 = pnand %p119_p0, %p116_p13 }
 0x268   :  { %124 = shalt.err (!%p121_p1)
}
 0x269   :  { %68 = dma.vmem_to_hbm [thread:$0]  %s66_s23, 128, %s171_s1, [#allocation5]  }
 0x26a   :  { %127 = dma.done.wait [#allocation5], 128  }
 0x26b   :  { %128 = vsyncadd [#allocation5], 4294967168 }
 0x26c   :  { %72 = vsyncpa [#allocation4], 1 }
 0x26d   :  { %73 = vsyncpa [#allocation5], 1 }

</bundles_post_ra>
